<compile_context>
chip_gen: v7x
topology: tpu7x:2x2x1
jax: 0.10.0
libtpu: 0.0.40
codegen_flags: <defaults>
</compile_context>

<pallas_src>
import functools

import jax
import jax.numpy as jnp
from jax.experimental import pallas as pl
from jax.experimental.pallas import tpu as pltpu


def cin_kernel(x_ref, gamma_ref, beta_ref, o_ref):
    # x_ref:     (1, TC, T)
    # gamma_ref: (1, TC, 1)  precomputed gamma = c @ Wg.T + bg
    # beta_ref:  (1, TC, 1)  precomputed beta  = c @ Wb.T + bb
    x = x_ref[0].astype(jnp.float32)          # (TC, T)
    gamma = gamma_ref[0].astype(jnp.float32)  # (TC, 1)
    beta = beta_ref[0].astype(jnp.float32)    # (TC, 1)

    t = x.shape[1]
    inv_t = jnp.float32(1.0 / t)

    # One pass over the tile for both moments (f32 accumulation).
    s1 = jnp.sum(x, axis=1, keepdims=True)            # (TC, 1)
    s2 = jnp.sum(x * x, axis=1, keepdims=True)        # (TC, 1)
    mean = s1 * inv_t
    var = jnp.maximum(s2 * inv_t - mean * mean, 0.0)  # guard tiny cancellation

    inv_std = jax.lax.rsqrt(var + 1e-8)               # EUP, on (TC,1) only
    scale = gamma * inv_std                           # (TC, 1)
    shift = beta - mean * scale                       # (TC, 1)

    # Second (and last) full-tile pass: fused scale + shift.
    o_ref[0] = (x * scale + shift).astype(o_ref.dtype)


def _choose_channel_tile(C, T, itemsize):
    """Largest channel tile s.t. double-buffered in+out stays well under VMEM."""
    budget = 16 << 20                       # ~16 MiB: fits 32 MiB scoped VMEM on all gens
    per_chan = T * max(itemsize, 4) * 4     # in + out, x2 buffers, f32 worst case
    tc = min(C, max(8, budget // max(per_chan, 1)))
    if tc < C:
        tc = max(8, (tc // 8) * 8)          # keep sublane (8) alignment when tiling
    return tc


@functools.partial(jax.jit, static_argnames=())
def cin_forward(x, c, gamma_w, gamma_b, beta_w, beta_b):
    """x: (B, dim_in, T); c: (B, style_num); weights in PyTorch Linear layout."""
    B, C, T = x.shape

    # Precompute the per-channel affine parameters with a plain XLA matmul.
    gamma = (c @ gamma_w.T + gamma_b)[:, :, None]  # (B, C, 1)
    beta = (c @ beta_w.T + beta_b)[:, :, None]     # (B, C, 1)

    tc = _choose_channel_tile(C, T, x.dtype.itemsize)
    grid = (B, pl.cdiv(C, tc))

    return pl.pallas_call(
        cin_kernel,
        out_shape=jax.ShapeDtypeStruct((B, C, T), x.dtype),
        grid=grid,
        in_specs=[
            pl.BlockSpec((1, tc, T), lambda b, ic: (b, ic, 0)),   # x tile
            pl.BlockSpec((1, tc, 1), lambda b, ic: (b, ic, 0)),   # gamma
            pl.BlockSpec((1, tc, 1), lambda b, ic: (b, ic, 0)),   # beta
        ],
        out_specs=pl.BlockSpec((1, tc, T), lambda b, ic: (b, ic, 0)),
        compiler_params=pltpu.CompilerParams(
            dimension_semantics=("parallel", "parallel"),
            vmem_limit_bytes=32 << 20,
        ),
    )(x, gamma, beta)


def cin_reference(x, c, gamma_w, gamma_b, beta_w, beta_b):
    """Pure-JAX reference mirroring the PyTorch forward."""
    u = jnp.mean(x, axis=2, keepdims=True)
    var = jnp.mean((x - u) * (x - u), axis=2, keepdims=True)
    std = jnp.sqrt(var + 1e-8)
    gamma = (c @ gamma_w.T + gamma_b)[:, :, None]
    beta = (c @ beta_w.T + beta_b)[:, :, None]
    return (x - u) / std * gamma + beta


if __name__ == "__main__":
    B, dim_in, style_num, T = 2, 4, 8, 16

    key = jax.random.PRNGKey(0)
    kx, kc, kgw, kgb, kbw, kbb = jax.random.split(key, 6)

    x = jax.random.normal(kx, (B, dim_in, T), dtype=jnp.float32)
    c = jax.random.normal(kc, (B, style_num), dtype=jnp.float32)

    # nn.Linear(style_num, dim_in) parameters (PyTorch layout).
    gamma_w = jax.random.normal(kgw, (dim_in, style_num), dtype=jnp.float32) * 0.1
    gamma_b = jax.random.normal(kgb, (dim_in,), dtype=jnp.float32) * 0.1
    beta_w = jax.random.normal(kbw, (dim_in, style_num), dtype=jnp.float32) * 0.1
    beta_b = jax.random.normal(kbb, (dim_in,), dtype=jnp.float32) * 0.1

    out = cin_forward(x, c, gamma_w, gamma_b, beta_w, beta_b)
    out = jax.block_until_ready(out)

    ref = cin_reference(x, c, gamma_w, gamma_b, beta_w, beta_b)
    assert out.shape == (B, dim_in, T)
    assert jnp.allclose(out, ref, atol=3e-5, rtol=3e-5), float(
        jnp.max(jnp.abs(out - ref)))

    print("KERNEL_OK")
</pallas_src>

<mosaic_0001>
module attributes {stable_mosaic.version = 11 : i64} {
  func.func @cin_kernel(%arg0: i32, %arg1: i32, %arg2: memref<1x4x16xf32, #tpu.memory_space<vmem>>, %arg3: memref<1x4x1xf32, #tpu.memory_space<vmem>>, %arg4: memref<1x4x1xf32, #tpu.memory_space<vmem>>, %arg5: memref<1x4x16xf32, #tpu.memory_space<vmem>>) attributes {dimension_semantics = [#tpu.dimension_semantics<parallel>, #tpu.dimension_semantics<parallel>], iteration_bounds = array<i64: 2, 1>, scalar_prefetch = 0 : i64, scratch_operands = 0 : i64, tpu.core_type = #tpu.core_type<tc>, window_params = [{transform_indices = @transform_0, window_bounds = array<i64: 1, 4, 16>}, {transform_indices = @transform_1, window_bounds = array<i64: 1, 4, 1>}, {transform_indices = @transform_2, window_bounds = array<i64: 1, 4, 1>}, {transform_indices = @transform_3, window_bounds = array<i64: 1, 4, 16>}]} {
    %c0 = arith.constant 0 : index
    %c0_0 = arith.constant 0 : index
    %c0_1 = arith.constant 0 : index
    %0 = vector.load %arg2[%c0, %c0_0, %c0_1] : memref<1x4x16xf32, #tpu.memory_space<vmem>>, vector<1x4x16xf32>
    %1 = vector.shape_cast %0 : vector<1x4x16xf32> to vector<4x16xf32>
    %c0_2 = arith.constant 0 : index
    %c0_3 = arith.constant 0 : index
    %c0_4 = arith.constant 0 : index
    %2 = vector.load %arg3[%c0_2, %c0_3, %c0_4] : memref<1x4x1xf32, #tpu.memory_space<vmem>>, vector<1x4x1xf32>
    %3 = vector.shape_cast %2 : vector<1x4x1xf32> to vector<4x1xf32>
    %c0_5 = arith.constant 0 : index
    %c0_6 = arith.constant 0 : index
    %c0_7 = arith.constant 0 : index
    %4 = vector.load %arg4[%c0_5, %c0_6, %c0_7] : memref<1x4x1xf32, #tpu.memory_space<vmem>>, vector<1x4x1xf32>
    %5 = vector.shape_cast %4 : vector<1x4x1xf32> to vector<4x1xf32>
    %cst = arith.constant dense<0.000000e+00> : vector<4xf32>
    %6 = vector.multi_reduction <add>, %1, %cst [1] : vector<4x16xf32> to vector<4xf32>
    %7 = vector.shape_cast %6 : vector<4xf32> to vector<4x1xf32>
    %8 = arith.mulf %1, %1 : vector<4x16xf32>
    %cst_8 = arith.constant dense<0.000000e+00> : vector<4xf32>
    %9 = vector.multi_reduction <add>, %8, %cst_8 [1] : vector<4x16xf32> to vector<4xf32>
    %10 = vector.shape_cast %9 : vector<4xf32> to vector<4x1xf32>
    %cst_9 = arith.constant 6.250000e-02 : f32
    %11 = vector.broadcast %cst_9 : f32 to vector<4x1xf32>
    %12 = arith.mulf %7, %11 : vector<4x1xf32>
    %cst_10 = arith.constant 6.250000e-02 : f32
    %13 = vector.broadcast %cst_10 : f32 to vector<4x1xf32>
    %14 = arith.mulf %10, %13 : vector<4x1xf32>
    %15 = arith.mulf %12, %12 : vector<4x1xf32>
    %16 = arith.subf %14, %15 : vector<4x1xf32>
    %cst_11 = arith.constant 0.000000e+00 : f32
    %17 = vector.broadcast %cst_11 : f32 to vector<4x1xf32>
    %18 = arith.maximumf %16, %17 : vector<4x1xf32>
    %cst_12 = arith.constant 9.99999993E-9 : f32
    %19 = vector.broadcast %cst_12 : f32 to vector<4x1xf32>
    %20 = arith.addf %18, %19 : vector<4x1xf32>
    %21 = math.rsqrt %20 : vector<4x1xf32>
    %22 = arith.mulf %3, %21 : vector<4x1xf32>
    %23 = arith.mulf %12, %22 : vector<4x1xf32>
    %24 = arith.subf %5, %23 : vector<4x1xf32>
    %25 = vector.broadcast %22 : vector<4x1xf32> to vector<4x16xf32>
    %26 = arith.mulf %1, %25 : vector<4x16xf32>
    %27 = vector.broadcast %24 : vector<4x1xf32> to vector<4x16xf32>
    %28 = arith.addf %26, %27 : vector<4x16xf32>
    %c0_13 = arith.constant 0 : index
    %c0_14 = arith.constant 0 : index
    %c0_15 = arith.constant 0 : index
    %29 = vector.load %arg5[%c0_13, %c0_14, %c0_15] : memref<1x4x16xf32, #tpu.memory_space<vmem>>, vector<1x4x16xf32>
    %30 = vector.shape_cast %29 : vector<1x4x16xf32> to vector<4x16xf32>
    %31 = vector.shape_cast %28 : vector<4x16xf32> to vector<1x4x16xf32>
    tpu.vector_store %arg5[%c0_13, %c0_14, %c0_15], %31 {strides = array<i32>} : memref<1x4x16xf32, #tpu.memory_space<vmem>>, vector<1x4x16xf32>,
    return
  }
  func.func @transform_0(%arg0: i32, %arg1: i32) -> (i32, i32, i32) {
    %c0_i32 = arith.constant 0 : i32
    %c0_i32_0 = arith.constant 0 : i32
    return %arg0, %arg1, %c0_i32 : i32, i32, i32
  }
  func.func @transform_1(%arg0: i32, %arg1: i32) -> (i32, i32, i32) {
    %c0_i32 = arith.constant 0 : i32
    %c0_i32_0 = arith.constant 0 : i32
    return %arg0, %arg1, %c0_i32 : i32, i32, i32
  }
  func.func @transform_2(%arg0: i32, %arg1: i32) -> (i32, i32, i32) {
    %c0_i32 = arith.constant 0 : i32
    %c0_i32_0 = arith.constant 0 : i32
    return %arg0, %arg1, %c0_i32 : i32, i32, i32
  }
  func.func @transform_3(%arg0: i32, %arg1: i32) -> (i32, i32, i32) {
    %c0_i32 = arith.constant 0 : i32
    %c0_i32_0 = arith.constant 0 : i32
    return %arg0, %arg1, %c0_i32 : i32, i32, i32
  }
}

</mosaic_0001>

<bundles_post_ra>
// kernel: cin_forward.1
= control target key start
LH: loop header
LB: loop body
LE: loop exit
PB: predicated region body
PF: predicated region fallthrough
CT: control target
= control target key end

     0   :  { %8 = vsyncpa [#allocation3], 0  ;;  %s693_s0 = inlined_call_operand.vmem [shape: f32[2,4,16], index: 0, kind: input, shape index: {}]   ;;  %s694_s1 = inlined_call_operand.vmem [shape: f32[2,4,1], index: 1, kind: input, shape index: {}]   ;;  %s695_s2 = inlined_call_operand.vmem [shape: f32[2,4,1], index: 2, kind: input, shape index: {}]   ;;  %s696_s3 = inlined_call_operand.hbm [shape: f32[2,4,16], index: 3, kind: output, shape index: {}]  }
   0x1   :  { %10 = vsyncpa [#allocation3 + $0x1], 0  ;;  %s572_s12 = smov 0   ;;  %s574_s13 = smov 0  }
   0x2   :  { %s576_s14 = smov 0   ;;  %s578_s15 = smov 0  }
   0x3   :  { %s580_s16 = smov 0   ;;  %s582_s17 = smov 0  }
   0x4 LB: > { %s397_s18 = sadd.s32 4294967295, %s548_s17   ;;  %s398_s19 = sadd.s32 4294967294, %s548_s17   ;;  %s548_s17 = sphi %s582_s17, %s16_s17   ;;  %s544_s16 = sphi %s580_s16, %s703_s16   ;;  %s540_s15 = sphi %s578_s15, %s702_s15   ;;  %s536_s14 = sphi %s576_s14, %s701_s14   ;;  %s532_s13 = sphi %s574_s13, %s700_s13   ;;  %s528_s12 = sphi %s572_s12, %s699_s12  }
   0x5   : > { %s28_s20 = sadd.s32 1, %s544_s16  ;;  %s121_s21 = sadd.s32 1, %s536_s14 }
   0x6   : > { %p30_p0 = scmp.ge.s32.totalorder %s28_s20, 2  ;;  %p131_p1 = scmp.ne.s32.totalorder %s536_s14, %s532_s13 }
   0x7   : > { %p132_p2 = scmp.eq.s32.totalorder %s397_s18, 1  ;;  %p137_p3 = scmp.ne.s32.totalorder %s532_s13, %s528_s12 }
   0x8   : > { %s705_s20 = smov (%p30_p0, %s28_s20), 0  ;;  %p138_p5 = scmp.eq.s32.totalorder %s398_s19, 1 }
   0x9   : > { %p612_p4 = por %p132_p2, %p131_p1  ;;  %s116_s23 = ssub.s32 %s544_s16, %s705_s20 }
   0xa   : > { %p401_p6 = scmp.ge.s32.totalorder %s548_s17, 1  ;;  %p119_p7 = scmp.eq.s32.totalorder %s116_s23, 0 }
   0xb   : > { %p619_p8 = por %p138_p5, %p137_p3  ;;  %p186_p9 = scmp.lt.s32.totalorder %s548_s17, 3 }
   0xc   : > { %s625_s25 = scalar_select %p119_p7, %s536_s14, %s121_s21  }
   0xd   : > { %p187_p10 = pnand %p401_p6, %p186_p9 }
   0xe   : > { %p226_p11 = scmp.lt.s32.totalorder (!%p187_p10), %s540_s15, 1  ;;  %vm250_vm0 = vcmask (!%p187_p10), 125952   ;;  %v550_v4 = vmov (!%p187_p10), 0   ;;  %s223_s10 = sand.u32 (!%p187_p10), 1, %s532_s13  }
   0xf   : > { %190 = sbr.rel (%p187_p10) target bundleno = 343 (0x157), region = 32  ;;  %466 = vset.pattern.permute.xlu1 (!%p187_p10), %v550_v4  ;;  %467 = vset.pattern.permute.xlu0 (!%p187_p10), %v550_v4  ;;  %s402_s11 = sshll.u32 (!%p187_p10), %s223_s10, 2 }
  0x10   : > { %s407_s18 = sshll.u32 (!%p187_p10), %s540_s15, 6  ;;  %s225_s19 = scalar_lea.vmem (!%p187_p10), [#allocation2], %s402_s11 }
  0x11   : > { %s296_s21 = sshll.u32 (!%p187_p10), %s225_s19, 4  ;;  %s282_s28 = scalar_lea.sflag (!%p187_p10), [#allocation3], %s223_s10  ;;  %s647_s21 = int_to_ptr.vmem [resolvable:$true] %s296_s21 }
  0x12   : > { %s470_s29 = scalar_lea.vmem (!%p187_p10), %s647_s21, 64 }
  0x13   : > { %p471_p12 = scmp.ne.s32.totalorder (!%p187_p10), %s647_s21, %s470_s29 }
  0x15   : > { %p472_p13 = pnand (!%p187_p10), %p471_p12, %p612_p4 }
  0x16   : > { %s227_s26 = scalar_select %p226_p11, %s540_s15, 1 }
  0x17   : > { %p473_p0 = pneg %p472_p13  ;;  %s551_s15 = smov [#allocation2]  }
  0x18   : > { %s403_s27 = sshll.u32 %s227_s26, 2 }
  0x19   : > { %s232_s30 = scalar_lea.vmem %s693_s0, %s403_s27  ;;  %s239_s6 = scalar_lea.vmem %s694_s1, %s403_s27 }
  0x1a   : > { %v247_v0 = vld [vmem:[%s232_s30] sm:$0xf]  ;;  %s246_s9 = scalar_lea.vmem %s695_s2, %s403_s27  ;;  %s645_s27 = scalar_lea.hbm %s696_s3, %s407_s18 }
  0x1b   : > { %v251_v1 = vsel %vm250_vm0, %v247_v0, 0.0  ;;  %v254_v2 = vmul.f32 %v247_v0, %v247_v0  ;;  %v248_v13 = vld [vmem:[%s239_s6] sm:$0xf]  ;;  %s474_s30 = sshll.u32 %s551_s15, 4  ;;  %s475_s30 = int_to_ptr.vmem [resolvable:$false] %s474_s30 }
  0x1c   : > { %252 = vadd.xlane.f32.xlu0 %v251_v1  ;;  %v249_v16 = vld [vmem:[%s246_s9] sm:$0xf]  ;;  %s476_s4 = scalar_lea.vmem %s475_s30, 128  ;;  %p477_p1 = scmp.lt.s32.totalorder %s647_s21, %s475_s30 }
  0x1d   : > { %v255_v3 = vsel %vm250_vm0, %v254_v2, 0.0  ;;  %p478_p2 = scmp.lt.s32.totalorder %s476_s4, %s470_s29 }
  0x1f   : > { %p479_p3 = por %p478_p2, %p477_p1 }
  0x20   : > { %256 = vadd.xlane.f32.xlu0 %v255_v3 }
  0x21   : > { %p480_p5 = pnand %p479_p3, %p473_p0 }
  0xa9   : > { %v253_v5 = vpop.xlane.xlu0 %252 }
  0xaa   : > { %v258_v6 = vmul.f32 0.0625, %v253_v5 }
  0xac   : > { %v260_v8 = vmul.f32 %v258_v6, %v258_v6 }
  0xad   : > { %v257_v7 = vpop.xlane.xlu0 %256 }
  0xae   : > { %v259_v9 = vmul.f32 0.0625, %v257_v7 }
  0xb0   : > { %v261_v10 = vsub.f32 %v259_v9, %v260_v8 }
  0xb2   : > { %v262_v11 = vmax.f32 %v261_v10, 0.0 }
  0xb4   : > { %v263_v12 = vadd.f32 1e-08, %v262_v11 }
  0xb6   : > { %468 = vrsqrt.f32 %v263_v12 }
  0xc0   : > { %v469_v14 = vpop.eup %468 }
  0xc1   : > { %v265_v15 = vmul.f32 %v469_v14, %v248_v13 }
  0xc3   : > { %270 = vperm.xlu1 %466, %v265_v15   ;;  %v266_v17 = vmul.f32 %v265_v15, %v258_v6 }
  0xc5   : > { %v267_v18 = vsub.f32 %v249_v16, %v266_v17 }
  0xc7   : > { %276 = vperm.xlu1 %466, %v267_v18  }
 0x142   : > { %v271_v19 = vpop.permute.xlu1 %270 }
 0x143   : > { %v273_v20 = vmul.f32 %v271_v19, %v247_v0 }
 0x146   : > { %v277_v21 = vpop.permute.xlu1 %276 }
 0x147   : > { %v279_v22 = vadd.f32 %v277_v21, %v273_v20 }
 0x149   : > { %280 = vst.msk [vmem:[%s225_s19] sm:$0xf] %vm250_vm0, %v279_v22 }
 0x14a   : > { %483 = shalt.err (!%p480_p5)
}
 0x14b   : > { %s484_s5 = scalar_lea.hbm %s645_s27, 64  ;;  %s488_s8 = scalar_lea.hbm %s696_s3, 128 }
 0x14c   : > { %p485_p6 = scmp.ne.s32.totalorder %s645_s27, %s484_s5  ;;  %p489_p10 = scmp.lt.u32.totalorder %s645_s27, %s696_s3 }
 0x14d   : > { %p490_p11 = scmp.lt.u32.totalorder %s488_s8, %s484_s5  ;;  %p492_p13 = scmp.lt.u32.totalorder %s484_s5, %s645_s27 }
 0x14e   : > { %p486_p7 = pnand %p485_p6, %p612_p4 }
 0x14f   : > { %p491_p12 = por %p490_p11, %p489_p10 }
 0x150   : > { %p487_p9 = pneg %p486_p7 }
 0x151   : > { %p493_p0 = por %p492_p13, %p491_p12 }
 0x153   : > { %p494_p1 = pnand %p493_p0, %p487_p9 }
 0x155   : > { %497 = shalt.err (!%p494_p1)
}
 0x156   : > { %410 = dma.vmem_to_hbm [thread:$0]  (%p612_p4), %s647_s21, 64, %s645_s27, %s282_s28  }
 0x157 PF: > { %p416_p2 = scmp.ge.s32.totalorder %s548_s17, 2  ;;  %s308_s11 = sand.u32 1, %s528_s12  }
 0x158   : > { %s309_s18 = scalar_lea.sflag [#allocation3], %s308_s11 }
 0x159   : > { %p413_p3 = pnand %p416_p2, %p619_p8 }
 0x15b   : > { %523 = dma.done.wait (!%p413_p3), %s309_s18, 64  }
 0x15c   : > { %525 = vsyncadd (!%p413_p3), %s309_s18, 4294967232  ;;  %s16_s17 = sadd.s32 1, %s548_s17   ;;  %s699_s12 = smov %s532_s13 }
 0x15d   : > { %p13_p5 = scmp.ge.s32.totalorder %s16_s17, 4   ;;  %s700_s13 = smov %s536_s14 }
 0x15e   : > { %s701_s14 = smov %s625_s25  ;;  %s702_s15 = smov %s544_s16 }
 0x15f   : > { %s703_s16 = smov %s705_s20  ;;  %15 = sbr.rel (!%p13_p5) target bundleno = 4 (0x4), region = 73 }
 0x166   :  { %314 = vsyncpa [#allocation3], 1 }
 0x167   :  { %316 = vsyncpa [#allocation3 + $0x1], 1 }

</bundles_post_ra>
